<compile_context>
chip_gen: v7x
topology: tpu7x:2x2x1
jax: 0.10.0
libtpu: 0.0.40
codegen_flags: <defaults>
</compile_context>

<pallas_src>
import jax
import jax.numpy as jnp
from jax.experimental import pallas as pl
from jax.experimental.pallas import tpu as pltpu


def _resistor_kernel(inv_r_ref, v_ref, o_ref):
    # inv_r_ref: (1, 1) SMEM scalar holding 1/R.  Body is a single VPU multiply.
    o_ref[...] = v_ref[...] * inv_r_ref[0, 0]


def _pick_block(M, N, itemsize, *, max_block_bytes=8 * 1024 * 1024):
    """Pick a lane-dense block that amortizes grid-step overhead while keeping
    the double-buffered (input + output) footprint well under v7x's 64 MiB VMEM."""
    # Lane (last) dim: take the full row when modest, otherwise a large
    # multiple of 128 so stores stay unmasked / full-width.
    if N <= 4096:
        tile_cols = N                       # full extent (any N is legal)
    else:
        tile_cols = 2048                    # lane-dense, multiple of 128

    # Sublane (second-to-last) dim: as many rows as fit the per-block budget.
    max_rows = max(8, max_block_bytes // max(1, tile_cols * itemsize))
    if M <= max_rows:
        tile_rows = M                       # full extent (any M is legal)
    else:
        tile_rows = max(8, (max_rows // 8) * 8)   # multiple of 8
    return tile_rows, tile_cols


def resistor_forward(V, raw_R):
    """ResistorModel.forward: V / exp(raw_R).

    V: (M, N) float32.  raw_R: scalar float32 (log of the resistance)."""
    M, N = V.shape
    itemsize = V.dtype.itemsize

    tile_rows, tile_cols = _pick_block(M, N, itemsize)
    grid = (pl.cdiv(M, tile_rows), pl.cdiv(N, tile_cols))

    # Hoist the scalar transcendental out of the kernel: one scalar XLA op.
    inv_r = jnp.reshape(1.0 / jnp.exp(raw_R.astype(jnp.float32)), (1, 1))

    # VMEM budget: 2 buffers x (input block + output block) + headroom,
    # clamped so it never approaches v7x's 64 MiB physical VMEM.
    block_bytes = tile_rows * tile_cols * itemsize
    vmem_limit = min(max(4 * block_bytes + 4 * 1024 * 1024, 32 * 1024 * 1024),
                     56 * 1024 * 1024)

    return pl.pallas_call(
        _resistor_kernel,
        out_shape=jax.ShapeDtypeStruct((M, N), V.dtype),
        grid_spec=pltpu.PrefetchScalarGridSpec(
            num_scalar_prefetch=0,
            grid=grid,
            in_specs=[
                pl.BlockSpec(memory_space=pltpu.SMEM),                     # 1/R scalar
                pl.BlockSpec((tile_rows, tile_cols), lambda i, j: (i, j)),  # V tile
            ],
            out_specs=pl.BlockSpec((tile_rows, tile_cols), lambda i, j: (i, j)),
        ),
        compiler_params=pltpu.CompilerParams(
            dimension_semantics=("parallel", "parallel"),  # megacore-shardable on v7x
            vmem_limit_bytes=vmem_limit,
        ),
    )(inv_r, V)


if __name__ == "__main__":
    key = jax.random.PRNGKey(0)

    # Deterministic parameter init mirroring nn.Parameter(torch.tensor(5.0).log())
    initial_R = 5.0
    raw_R = jnp.log(jnp.float32(initial_R))

    # Small example input (voltages)
    V = jax.random.normal(key, (16, 128), dtype=jnp.float32)

    out = resistor_forward(V, raw_R)
    out = jax.block_until_ready(out)

    # Reference check in plain JAX
    ref = V / jnp.exp(raw_R)
    assert jnp.allclose(out, ref, rtol=1e-6, atol=1e-6), "mismatch vs reference"

    print("KERNEL_OK")
</pallas_src>

<mosaic_0001>
module attributes {stable_mosaic.version = 11 : i64} {
  func.func @_resistor_kernel(%arg0: i32, %arg1: i32, %arg2: memref<1x1xf32, #tpu.memory_space<smem>>, %arg3: memref<16x128xf32, #tpu.memory_space<vmem>>, %arg4: memref<16x128xf32, #tpu.memory_space<vmem>>) attributes {dimension_semantics = [#tpu.dimension_semantics<parallel>, #tpu.dimension_semantics<parallel>], iteration_bounds = array<i64: 1, 1>, scalar_prefetch = 0 : i64, scratch_operands = 0 : i64, tpu.core_type = #tpu.core_type<tc>, window_params = [{transform_indices = @transform_0, window_bounds = array<i64: 1, 1>}, {transform_indices = @transform_1, window_bounds = array<i64: 16, 128>}, {transform_indices = @transform_2, window_bounds = array<i64: 16, 128>}]} {
    %c0 = arith.constant 0 : index
    %c0_0 = arith.constant 0 : index
    %0 = vector.load %arg3[%c0, %c0_0] : memref<16x128xf32, #tpu.memory_space<vmem>>, vector<16x128xf32>
    %c0_1 = arith.constant 0 : index
    %c0_2 = arith.constant 0 : index
    %1 = memref.load %arg2[%c0_1, %c0_2] : memref<1x1xf32, #tpu.memory_space<smem>>
    %2 = vector.broadcast %1 : f32 to vector<16x128xf32>
    %3 = arith.mulf %0, %2 : vector<16x128xf32>
    %c0_3 = arith.constant 0 : index
    %c0_4 = arith.constant 0 : index
    %4 = vector.load %arg4[%c0_3, %c0_4] : memref<16x128xf32, #tpu.memory_space<vmem>>, vector<16x128xf32>
    tpu.vector_store %arg4[%c0_3, %c0_4], %3 {strides = array<i32>} : memref<16x128xf32, #tpu.memory_space<vmem>>, vector<16x128xf32>,
    return
  }
  func.func @transform_0(%arg0: i32, %arg1: i32) -> (i32, i32) {
    %c0_i32 = arith.constant 0 : i32
    %c0_i32_0 = arith.constant 0 : i32
    %c0_i32_1 = arith.constant 0 : i32
    return %c0_i32, %c0_i32_0 : i32, i32
  }
  func.func @transform_1(%arg0: i32, %arg1: i32) -> (i32, i32) {
    %c0_i32 = arith.constant 0 : i32
    return %arg0, %arg1 : i32, i32
  }
  func.func @transform_2(%arg0: i32, %arg1: i32) -> (i32, i32) {
    %c0_i32 = arith.constant 0 : i32
    return %arg0, %arg1 : i32, i32
  }
}

</mosaic_0001>

<bundles_post_ra>
// kernel: tpu_custom_call.1
= control target key start
LH: loop header
LB: loop body
LE: loop exit
PB: predicated region body
PF: predicated region fallthrough
CT: control target
= control target key end

     0   :  { %8 = vsyncpa [#allocation4], 0  ;;  %s156_s0 = inlined_call_operand.<no memory space> [shape: f32[1,1], index: 0, kind: input, shape index: {}]   ;;  %s157_s1 = inlined_call_operand.hbm [shape: f32[16,128], index: 1, kind: input, shape index: {}]   ;;  %s158_s2 = inlined_call_operand.hbm [shape: f32[16,128], index: 2, kind: output, shape index: {}]  }
   0x1   :  { %9 = vsyncpa [#allocation5], 0  ;;  %s104_s9 = smov [#allocation3]   ;;  %s56_s13 = scalar_lea.hbm %s157_s1, 256 }
   0x2   :  { %s17_s10 = sshll.u32 %s104_s9, 4  ;;  %p57_p0 = scmp.ne.s32.totalorder %s157_s1, %s56_s13  ;;  %s18_s10 = int_to_ptr.vmem [resolvable:$true] %s17_s10 }
   0x3   :  { %p60_p1 = scmp.lt.u32.totalorder %s56_s13, %s157_s1 }
   0x5   :  { %p62_p2 = pnand %p60_p1, %p57_p0 }
   0x7   :  { %65 = shalt.err (!%p62_p2)
}
   0x8   :  { %s66_s18 = scalar_lea.vmem %s18_s10, 256  ;;  %p71_p4 = scmp.lt.s32.totalorder %s18_s10, %s18_s10 }
   0x9   :  { %p67_p3 = scmp.ne.s32.totalorder %s18_s10, %s66_s18  ;;  %p72_p5 = scmp.lt.s32.totalorder %s66_s18, %s66_s18 }
   0xb   :  { %p73_p6 = por %p72_p5, %p71_p4 }
   0xd   :  { %p74_p7 = pnand %p73_p6, %p67_p3 }
   0xf   :  { %77 = shalt.err (!%p74_p7)
}
  0x10   :  { %s105_s19 = smov 128   ;;  %s106_s20 = smov 8  }
  0x11   :  { %23 = dma.hbm_to_vmem [thread:$0]  %s157_s1, 256, %s18_s10, [#allocation4], %s105_s19, %s105_s19, %s106_s20  }
  0x12   :  { %100 = dma.done.wait [#allocation4], 256  }
  0x13   :  { %101 = vsyncadd [#allocation4], 4294967040  ;;  %v30_v0 = vstv %s156_s0  ;;  %s107_s25 = smov [#allocation6]   ;;  %v27_v1 = vld [vmem:[#allocation3] sm:$0xff]  ;;  %v28_v2 = vld [vmem:[#allocation3 + $0x8] sm:$0xff] }
  0x14   :  { %s40_s26 = sshll.u32 %s107_s25, 4  ;;  %v31_v3 = vmul.f32 %v30_v0, %v27_v1  ;;  %v32_v4 = vmul.f32 %v30_v0, %v28_v2  ;;  %s41_s26 = int_to_ptr.vmem [resolvable:$true] %s40_s26 }
  0x15   :  { %s78_s27 = scalar_lea.vmem %s41_s26, 256  ;;  %p83_p9 = scmp.lt.s32.totalorder %s41_s26, %s41_s26 }
  0x16   :  { %33 = vst [vmem:[#allocation6] sm:$0xff] %v31_v3  ;;  %34 = vst [vmem:[#allocation6 + $0x8] sm:$0xff] %v32_v4  ;;  %p79_p8 = scmp.ne.s32.totalorder %s41_s26, %s78_s27  ;;  %p84_p10 = scmp.lt.s32.totalorder %s78_s27, %s78_s27 }
  0x18   :  { %p85_p11 = por %p84_p10, %p83_p9 }
  0x1a   :  { %p86_p12 = pnand %p85_p11, %p79_p8 }
  0x1c   :  { %89 = shalt.err (!%p86_p12)
}
  0x1d   :  { %s90_s0 = scalar_lea.hbm %s158_s2, 256 }
  0x1e   :  { %p91_p13 = scmp.ne.s32.totalorder %s158_s2, %s90_s0  ;;  %p94_p0 = scmp.lt.u32.totalorder %s90_s0, %s158_s2 }
  0x20   :  { %p96_p1 = pnand %p94_p0, %p91_p13 }
  0x22   :  { %99 = shalt.err (!%p96_p1)
}
  0x23   :  { %46 = dma.vmem_to_hbm [thread:$0]  %s41_s26, 256, %s158_s2, [#allocation5], %s105_s19, %s105_s19, %s106_s20  }
  0x24   :  { %102 = dma.done.wait [#allocation5], 256  }
  0x25   :  { %103 = vsyncadd [#allocation5], 4294967040 }
  0x26   :  { %50 = vsyncpa [#allocation4], 1 }
  0x27   :  { %51 = vsyncpa [#allocation5], 1 }

</bundles_post_ra>
